<compile_context>
chip_gen: v7x
topology: tpu7x:2x2x1
jax: 0.10.0
libtpu: 0.0.40
codegen_flags: <defaults>
</compile_context>

<pallas_src>
import jax
import jax.numpy as jnp
from jax.experimental import pallas as pl
from jax.experimental.pallas import tpu as pltpu


def _round_up(n, m):
    return ((n + m - 1) // m) * m


def _linear_kernel(x_ref, w_ref, b_ref, o_ref, acc_ref):
    # grid = (M tiles, N tiles, K tiles); K is the reduction axis ("arbitrary").
    k = pl.program_id(2)

    @pl.when(k == 0)
    def _():
        acc_ref[...] = jnp.zeros_like(acc_ref)

    # MXU matmul with f32 accumulation (operands may be f32 or bf16).
    acc_ref[...] += jnp.dot(
        x_ref[...], w_ref[...], preferred_element_type=jnp.float32
    )

    @pl.when(k == pl.num_programs(2) - 1)
    def _():
        # f32 bias add in the epilogue, then cast to the output dtype.
        o_ref[...] = (acc_ref[...] + b_ref[...]).astype(o_ref.dtype)


def input_classifier_forward(x, weight, bias, *, compute_dtype=None):
    """out = x.reshape(B, -1) @ weight + bias

    x:      (B, ...)                 any trailing shape (flattened like input.view(B, -1))
    weight: (D, num_classes)         (= PyTorch nn.Linear weight, transposed)
    bias:   (num_classes,)
    compute_dtype: optional MXU operand dtype (e.g. jnp.bfloat16 on v6e/v7x);
                   accumulation and the bias add stay in f32 regardless.
    """
    B = x.shape[0]
    x2d = x.reshape(B, -1)                      # glue: flatten like input.view(B, -1)
    D = x2d.shape[1]
    C = weight.shape[1]
    assert weight.shape[0] == D
    out_dtype = x2d.dtype

    if compute_dtype is not None:
        x2d = x2d.astype(compute_dtype)
        weight = weight.astype(compute_dtype)

    # ---- Tile / padding choices -------------------------------------------
    # N (classes): multiple of 128 -> unmasked lane-dense output stores.
    tn = 128
    Np = _round_up(C, tn)
    # M (batch): at least the f32 sublane granule (8); 128-row tiles when big.
    if B >= 128:
        tm = 128
        Mp = _round_up(B, tm)
    else:
        tm = _round_up(max(B, 8), 8)
        Mp = tm
    # K (features): single block when small; 2048-wide K tiles + f32 accumulator
    # when D is large (keeps the weight working set far below v7x's 64 MiB VMEM).
    if D <= 2048:
        tk = _round_up(D, 128)
        Kp = tk
    else:
        tk = 2048
        Kp = _round_up(D, tk)

    # Zero padding (plain-JAX glue): padded rows/cols contribute 0 to the matmul
    # and padded output rows/cols are sliced away below.
    xp = jnp.pad(x2d, ((0, Mp - B), (0, Kp - D)))
    wp = jnp.pad(weight, ((0, Kp - D), (0, Np - C)))
    bp = jnp.pad(bias.astype(jnp.float32).reshape(1, C), ((0, 0), (0, Np - C)))

    grid = (Mp // tm, Np // tn, Kp // tk)

    out_padded = pl.pallas_call(
        _linear_kernel,
        out_shape=jax.ShapeDtypeStruct((Mp, Np), out_dtype),
        grid_spec=pltpu.PrefetchScalarGridSpec(
            num_scalar_prefetch=0,
            grid=grid,
            in_specs=[
                pl.BlockSpec((tm, tk), lambda i, j, k: (i, k)),   # activations
                pl.BlockSpec((tk, tn), lambda i, j, k: (k, j)),   # weight
                pl.BlockSpec((1, tn), lambda i, j, k: (0, j)),    # bias (f32, lane-padded)
            ],
            out_specs=pl.BlockSpec((tm, tn), lambda i, j, k: (i, j)),
            scratch_shapes=[pltpu.VMEM((tm, tn), jnp.float32)],   # f32 accumulator
        ),
        compiler_params=pltpu.CompilerParams(
            dimension_semantics=("parallel", "parallel", "arbitrary"),
        ),
    )(xp, wp, bp)

    return out_padded[:B, :C]


def init_params(key, input_dim, num_classes=10, dtype=jnp.float32):
    # Deterministic synthetic init (mimics nn.Linear's uniform(-1/sqrt(D), 1/sqrt(D))).
    kw, kb = jax.random.split(key)
    bound = 1.0 / jnp.sqrt(jnp.asarray(input_dim, dtype))
    weight = jax.random.uniform(kw, (input_dim, num_classes), dtype, -bound, bound)
    bias = jax.random.uniform(kb, (num_classes,), dtype, -bound, bound)
    return weight, bias


if __name__ == "__main__":
    key = jax.random.PRNGKey(0)
    kx, kp = jax.random.split(key)

    # Example input: NCHW (B=2, C=4, H=16, W=16) -> input_dim = 4*16*16 = 1024
    B, C, H, W = 2, 4, 16, 16
    num_classes = 10
    input_dim = C * H * W

    x = jax.random.normal(kx, (B, C, H, W), dtype=jnp.float32)
    weight, bias = init_params(kp, input_dim, num_classes)

    ref = x.reshape(B, -1) @ weight + bias

    # f32 path (exact semantics of the PyTorch module).
    out = input_classifier_forward(x, weight, bias)
    out = jax.block_until_ready(out)
    assert out.shape == (B, num_classes)
    assert jnp.allclose(out, ref, atol=1e-4, rtol=1e-4)

    # bf16-operand path (v6e/v7x MXU fast path, f32 accumulation) — looser check.
    out_bf16 = input_classifier_forward(x, weight, bias, compute_dtype=jnp.bfloat16)
    out_bf16 = jax.block_until_ready(out_bf16)
    assert out_bf16.shape == (B, num_classes)
    assert jnp.allclose(out_bf16, ref, atol=3e-2, rtol=3e-2)

    print("KERNEL_OK")
</pallas_src>

<mosaic_0001>
module attributes {stable_mosaic.version = 11 : i64} {
  func.func @_linear_kernel(%arg0: i32, %arg1: i32, %arg2: i32, %arg3: memref<8x1024xf32, #tpu.memory_space<vmem>>, %arg4: memref<1024x128xf32, #tpu.memory_space<vmem>>, %arg5: memref<1x128xf32, #tpu.memory_space<vmem>>, %arg6: memref<8x128xf32, #tpu.memory_space<vmem>>, %arg7: memref<8x128xf32, #tpu.memory_space<vmem>>) attributes {dimension_semantics = [#tpu.dimension_semantics<parallel>, #tpu.dimension_semantics<parallel>, #tpu.dimension_semantics<arbitrary>], iteration_bounds = array<i64: 1, 1, 1>, scalar_prefetch = 0 : i64, scratch_operands = 1 : i64, tpu.core_type = #tpu.core_type<tc>, window_params = [{transform_indices = @transform_0, window_bounds = array<i64: 8, 1024>}, {transform_indices = @transform_1, window_bounds = array<i64: 1024, 128>}, {transform_indices = @transform_2, window_bounds = array<i64: 1, 128>}, {transform_indices = @transform_3, window_bounds = array<i64: 8, 128>}]} {
    %c0_i32 = arith.constant 0 : i32
    %0 = arith.cmpi eq, %arg2, %c0_i32 : i32
    %1 = arith.extui %0 : i1 to i32
    %c0_i32_0 = arith.constant 0 : i32
    %2 = arith.cmpi ne, %1, %c0_i32_0 : i32
    scf.if %2 {
      %cst_10 = arith.constant 0.000000e+00 : f32
      %12 = vector.broadcast %cst_10 : f32 to vector<8x128xf32>
      %c0_11 = arith.constant 0 : index
      %c0_12 = arith.constant 0 : index
      %13 = vector.load %arg7[%c0_11, %c0_12] : memref<8x128xf32, #tpu.memory_space<vmem>>, vector<8x128xf32>
      tpu.vector_store %arg7[%c0_11, %c0_12], %12 {strides = array<i32>} : memref<8x128xf32, #tpu.memory_space<vmem>>, vector<8x128xf32>,
    } else {
    }
    %c0 = arith.constant 0 : index
    %c0_1 = arith.constant 0 : index
    %3 = vector.load %arg7[%c0, %c0_1] : memref<8x128xf32, #tpu.memory_space<vmem>>, vector<8x128xf32>
    %c0_2 = arith.constant 0 : index
    %c0_3 = arith.constant 0 : index
    %4 = vector.load %arg3[%c0_2, %c0_3] : memref<8x1024xf32, #tpu.memory_space<vmem>>, vector<8x1024xf32>
    %c0_4 = arith.constant 0 : index
    %c0_5 = arith.constant 0 : index
    %5 = vector.load %arg4[%c0_4, %c0_5] : memref<1024x128xf32, #tpu.memory_space<vmem>>, vector<1024x128xf32>
    %cst = arith.constant dense<0.000000e+00> : vector<8x128xf32>
    %6 = tpu.matmul %4, %5, %cst {dimension_numbers = #tpu.dot_dimension_numbers<[1], [0], [0], [1], [0, 0, 1, 1], [], []>} : vector<8x1024xf32>, vector<1024x128xf32>, vector<8x128xf32> -> vector<8x128xf32>
    %7 = arith.addf %3, %6 : vector<8x128xf32>
    %c0_6 = arith.constant 0 : index
    %c0_7 = arith.constant 0 : index
    %8 = vector.load %arg7[%c0_6, %c0_7] : memref<8x128xf32, #tpu.memory_space<vmem>>, vector<8x128xf32>
    tpu.vector_store %arg7[%c0_6, %c0_7], %7 {strides = array<i32>} : memref<8x128xf32, #tpu.memory_space<vmem>>, vector<8x128xf32>,
    %c0_i32_8 = arith.constant 0 : i32
    %9 = arith.cmpi eq, %arg2, %c0_i32_8 : i32
    %10 = arith.extui %9 : i1 to i32
    %c0_i32_9 = arith.constant 0 : i32
    %11 = arith.cmpi ne, %10, %c0_i32_9 : i32
    scf.if %11 {
      %c0_10 = arith.constant 0 : index
      %c0_11 = arith.constant 0 : index
      %12 = vector.load %arg7[%c0_10, %c0_11] : memref<8x128xf32, #tpu.memory_space<vmem>>, vector<8x128xf32>
      %c0_12 = arith.constant 0 : index
      %c0_13 = arith.constant 0 : index
      %13 = vector.load %arg5[%c0_12, %c0_13] : memref<1x128xf32, #tpu.memory_space<vmem>>, vector<1x128xf32>
      %14 = vector.broadcast %13 : vector<1x128xf32> to vector<8x128xf32>
      %15 = arith.addf %12, %14 : vector<8x128xf32>
      %c0_14 = arith.constant 0 : index
      %c0_15 = arith.constant 0 : index
      %16 = vector.load %arg6[%c0_14, %c0_15] : memref<8x128xf32, #tpu.memory_space<vmem>>, vector<8x128xf32>
      tpu.vector_store %arg6[%c0_14, %c0_15], %15 {strides = array<i32>} : memref<8x128xf32, #tpu.memory_space<vmem>>, vector<8x128xf32>,
    } else {
    }
    return
  }
  func.func @transform_0(%arg0: i32, %arg1: i32, %arg2: i32) -> (i32, i32) {
    %c0_i32 = arith.constant 0 : i32
    return %arg0, %arg2 : i32, i32
  }
  func.func @transform_1(%arg0: i32, %arg1: i32, %arg2: i32) -> (i32, i32) {
    %c0_i32 = arith.constant 0 : i32
    return %arg2, %arg1 : i32, i32
  }
  func.func @transform_2(%arg0: i32, %arg1: i32, %arg2: i32) -> (i32, i32) {
    %c0_i32 = arith.constant 0 : i32
    %c0_i32_0 = arith.constant 0 : i32
    return %c0_i32, %arg1 : i32, i32
  }
  func.func @transform_3(%arg0: i32, %arg1: i32, %arg2: i32) -> (i32, i32) {
    %c0_i32 = arith.constant 0 : i32
    return %arg0, %arg1 : i32, i32
  }
}

</mosaic_0001>

<bundles_post_ra>
// kernel: tpu_custom_call.1
= control target key start
LH: loop header
LB: loop body
LE: loop exit
PB: predicated region body
PF: predicated region fallthrough
CT: control target
= control target key end

     0   :  { %8 = vsyncpa [#allocation4], 0  ;;  %s911_s0 = inlined_call_operand.hbm [shape: f32[8,1024], index: 0, kind: input, shape index: {}]   ;;  %s912_s1 = inlined_call_operand.hbm [shape: f32[1024,128], index: 1, kind: input, shape index: {}]   ;;  %s913_s2 = inlined_call_operand.vmem [shape: f32[1,128], index: 2, kind: input, shape index: {}]   ;;  %s914_s3 = inlined_call_operand.hbm [shape: f32[8,128], index: 3, kind: output, shape index: {}]  }
   0x1   :  { %9 = vsyncpa [#allocation7], 0 }
   0x2   :  { %10 = vsyncpa [#allocation5], 0  ;;  %s840_s12 = smov [#allocation3]   ;;  %s841_s14 = smov [#allocation6]  }
   0x3   :  { %s17_s13 = sshll.u32 %s840_s12, 4  ;;  %s26_s15 = sshll.u32 %s841_s14, 4  ;;  %s18_s13 = int_to_ptr.vmem [resolvable:$true] %s17_s13  ;;  %s865_s15 = int_to_ptr.vmem [resolvable:$true] %s26_s15 }
   0x4   :  { %s768_s18 = scalar_lea.hbm %s911_s0, 1024 }
   0x5   :  { %p769_p0 = scmp.ne.s32.totalorder %s911_s0, %s768_s18  ;;  %p772_p1 = scmp.lt.u32.totalorder %s768_s18, %s911_s0 }
   0x7   :  { %p774_p2 = pnand %p772_p1, %p769_p0 }
   0x9   :  { %777 = shalt.err (!%p774_p2)
}
   0xa   :  { %s778_s23 = scalar_lea.vmem %s18_s13, 1024  ;;  %p783_p4 = scmp.lt.s32.totalorder %s18_s13, %s18_s13 }
   0xb   :  { %p779_p3 = scmp.ne.s32.totalorder %s18_s13, %s778_s23  ;;  %p784_p5 = scmp.lt.s32.totalorder %s778_s23, %s778_s23 }
   0xd   :  { %p785_p6 = por %p784_p5, %p783_p4 }
   0xf   :  { %p786_p7 = pnand %p785_p6, %p779_p3 }
  0x11   :  { %789 = shalt.err (!%p786_p7)
}
  0x12   :  { %20 = dma.hbm_to_vmem [thread:$0]  %s911_s0, 1024, %s18_s13, [#allocation4]  }
  0x13   :  { %s790_s28 = scalar_lea.hbm %s912_s1, 16384 }
  0x14   :  { %p791_p8 = scmp.ne.s32.totalorder %s912_s1, %s790_s28  ;;  %p794_p9 = scmp.lt.u32.totalorder %s790_s28, %s912_s1 }
  0x16   :  { %p796_p10 = pnand %p794_p9, %p791_p8 }
  0x18   :  { %799 = shalt.err (!%p796_p10)
}
  0x19   :  { %s800_s6 = scalar_lea.vmem %s865_s15, 16384  ;;  %p805_p12 = scmp.lt.s32.totalorder %s865_s15, %s865_s15 }
  0x1a   :  { %p801_p11 = scmp.ne.s32.totalorder %s865_s15, %s800_s6  ;;  %p806_p13 = scmp.lt.s32.totalorder %s800_s6, %s800_s6 }
  0x1c   :  { %p807_p0 = por %p806_p13, %p805_p12 }
  0x1e   :  { %p808_p1 = pnand %p807_p0, %p801_p11 }
  0x20   :  { %811 = shalt.err (!%p808_p1)
}
  0x21   :  { %s842_s0 = smov 128   ;;  %s843_s7 = smov 8  }
  0x22   :  { %32 = dma.hbm_to_vmem [thread:$0]  %s912_s1, 16384, %s865_s15, [#allocation7], %s842_s0, %s842_s0, %s843_s7  }
  0x23   :  { %834 = dma.done.wait [#allocation4], 1024  }
  0x24   :  { %835 = vsyncadd [#allocation4], 4294966272 }
  0x25   :  { %836 = dma.done.wait [#allocation7], 16384  }
  0x26   :  { %837 = vsyncadd [#allocation7], 4294950912  ;;  %v71_v0 = vld [vmem:[#allocation6 + $0x80] sm:$0xff]  ;;  %v72_v1 = vld [vmem:[#allocation6 + $0x88] sm:$0xff]  ;;  %s844_s11 = smov [#allocation8]  }
  0x27   :  { %v103_v2 = vld [vmem:[#allocation6 + $0x180] sm:$0xff]  ;;  %v635_v3 = vpack.c.bf16 %v72_v1, %v71_v0  ;;  %v104_v4 = vld [vmem:[#allocation6 + $0x188] sm:$0xff]  ;;  %v73_v11 = vld [vmem:[#allocation6 + $0x90] sm:$0xff]  ;;  %s484_s12 = sshll.u32 %s844_s11, 4  ;;  %s485_s12 = int_to_ptr.vmem [resolvable:$true] %s484_s12 }
  0x28   :  { %v55_v5 = vld [vmem:[#allocation6] sm:$0xff]  ;;  %v56_v6 = vld [vmem:[#allocation6 + $0x8] sm:$0xff]  ;;  %v667_v7 = vpack.c.bf16 %v104_v4, %v103_v2  ;;  %v74_v13 = vld [vmem:[#allocation6 + $0x98] sm:$0xff]  ;;  %s812_s13 = scalar_lea.vmem %s485_s12, 128  ;;  %p817_p3 = scmp.lt.s32.totalorder %s485_s12, %s485_s12 }
  0x29   :  { %v637_v8 = vpack.c.bf16 %v56_v6, %v55_v5  ;;  %v87_v9 = vld [vmem:[#allocation6 + $0x100] sm:$0xff]  ;;  %v88_v10 = vld [vmem:[#allocation6 + $0x108] sm:$0xff]  ;;  %636 = vmatprep.subr.bf16.mxu0 %v635_v3  ;;  %v105_v14 = vld [vmem:[#allocation6 + $0x190] sm:$0xff]  ;;  %v639_v16 = vpack.c.bf16 %v74_v13, %v73_v11  ;;  %p813_p2 = scmp.ne.s32.totalorder %s485_s12, %s812_s13  ;;  %p818_p4 = scmp.lt.s32.totalorder %s812_s13, %s812_s13 }
  0x2a   :  { %v669_v12 = vpack.c.bf16 %v88_v10, %v87_v9  ;;  %v106_v15 = vld [vmem:[#allocation6 + $0x198] sm:$0xff]  ;;  %668 = vmatprep.subr.bf16.mxu1 %v667_v7  ;;  %v57_v18 = vld [vmem:[#allocation6 + $0x10] sm:$0xff]  ;;  %v75_v23 = vld [vmem:[#allocation6 + $0xa0] sm:$0xff] }
  0x2b   :  { %638 = vmatpush3.bf16.msra.mxu0 %v637_v8  ;;  %v671_v17 = vpack.c.bf16 %v106_v15, %v105_v14  ;;  %v58_v19 = vld [vmem:[#allocation6 + $0x18] sm:$0xff]  ;;  %v89_v20 = vld [vmem:[#allocation6 + $0x110] sm:$0xff]  ;;  %v76_v24 = vld [vmem:[#allocation6 + $0xa8] sm:$0xff]  ;;  %p819_p5 = por %p818_p4, %p817_p3 }
  0x2c   :  { %670 = vmatpush3.bf16.msra.mxu1 %v669_v12  ;;  %v641_v21 = vpack.c.bf16 %v58_v19, %v57_v18  ;;  %v90_v22 = vld [vmem:[#allocation6 + $0x118] sm:$0xff]  ;;  %640 = vmatprep.subr.bf16.mxu0 %v639_v16  ;;  %v643_v26 = vpack.c.bf16 %v76_v24, %v75_v23  ;;  %v107_v27 = vld [vmem:[#allocation6 + $0x1a0] sm:$0xff]  ;;  %v108_v28 = vld [vmem:[#allocation6 + $0x1a8] sm:$0xff] }
  0x2d   :  { %672 = vmatprep.subr.bf16.mxu1 %v671_v17  ;;  %v673_v25 = vpack.c.bf16 %v90_v22, %v89_v20  ;;  %v59_v29 = vld [vmem:[#allocation6 + $0x20] sm:$0xff]  ;;  %v675_v30 = vpack.c.bf16 %v108_v28, %v107_v27  ;;  %v60_v31 = vld [vmem:[#allocation6 + $0x28] sm:$0xff]  ;;  %v77_v35 = vld [vmem:[#allocation6 + $0xb0] sm:$0xff]  ;;  %p820_p6 = pnand %p819_p5, %p813_p2 }
  0x2e   :  { %v91_v32 = vld [vmem:[#allocation6 + $0x120] sm:$0xff]  ;;  %v92_v33 = vld [vmem:[#allocation6 + $0x128] sm:$0xff]  ;;  %v645_v34 = vpack.c.bf16 %v60_v31, %v59_v29  ;;  %v78_v36 = vld [vmem:[#allocation6 + $0xb8] sm:$0xff] }
  0x2f   :  { %642 = vmatpush3.bf16.msra.mxu0 %v641_v21  ;;  %v109_v37 = vld [vmem:[#allocation6 + $0x1b0] sm:$0xff]  ;;  %v677_v38 = vpack.c.bf16 %v92_v33, %v91_v32  ;;  %v647_v39 = vpack.c.bf16 %v78_v36, %v77_v35  ;;  %v110_v40 = vld [vmem:[#allocation6 + $0x1b8] sm:$0xff]  ;;  %v79_v46 = vld [vmem:[#allocation6 + $0xc0] sm:$0xff] }
  0x30   :  { %674 = vmatpush3.bf16.msra.mxu1 %v673_v25  ;;  %644 = vmatprep.subr.bf16.mxu0 %v643_v26  ;;  %v61_v41 = vld [vmem:[#allocation6 + $0x30] sm:$0xff]  ;;  %v62_v42 = vld [vmem:[#allocation6 + $0x38] sm:$0xff]  ;;  %v679_v43 = vpack.c.bf16 %v110_v40, %v109_v37  ;;  %v80_v47 = vld [vmem:[#allocation6 + $0xc8] sm:$0xff] }
  0x31   :  { %676 = vmatprep.subr.bf16.mxu1 %v675_v30  ;;  %v93_v44 = vld [vmem:[#allocation6 + $0x130] sm:$0xff]  ;;  %v94_v45 = vld [vmem:[#allocation6 + $0x138] sm:$0xff]  ;;  %v111_v48 = vld [vmem:[#allocation6 + $0x1c0] sm:$0xff]  ;;  %v649_v50 = vpack.c.bf16 %v62_v42, %v61_v41  ;;  %v651_v52 = vpack.c.bf16 %v80_v47, %v79_v46 }
  0x32   :  { %v112_v49 = vld [vmem:[#allocation6 + $0x1c8] sm:$0xff]  ;;  %v681_v51 = vpack.c.bf16 %v94_v45, %v93_v44  ;;  %v63_v53 = vld [vmem:[#allocation6 + $0x40] sm:$0xff]  ;;  %v81_v58 = vld [vmem:[#allocation6 + $0xd0] sm:$0xff] }
  0x33   :  { %646 = vmatpush3.bf16.msra.mxu0 %v645_v34  ;;  %v64_v54 = vld [vmem:[#allocation6 + $0x48] sm:$0xff]  ;;  %v95_v55 = vld [vmem:[#allocation6 + $0x140] sm:$0xff]  ;;  %v683_v56 = vpack.c.bf16 %v112_v49, %v111_v48  ;;  %v82_v59 = vld [vmem:[#allocation6 + $0xd8] sm:$0xff] }
  0x34   :  { %678 = vmatpush3.bf16.msra.mxu1 %v677_v38  ;;  %648 = vmatprep.subr.bf16.mxu0 %v647_v39  ;;  %v96_v57 = vld [vmem:[#allocation6 + $0x148] sm:$0xff]  ;;  %v113_v60 = vld [vmem:[#allocation6 + $0x1d0] sm:$0xff]  ;;  %v114_v61 = vld [vmem:[#allocation6 + $0x1d8] sm:$0xff]  ;;  %v653_v62 = vpack.c.bf16 %v64_v54, %v63_v53  ;;  %v655_v0 = vpack.c.bf16 %v82_v59, %v81_v58 }
  0x35   :  { %680 = vmatprep.subr.bf16.mxu1 %v679_v43  ;;  %v685_v63 = vpack.c.bf16 %v96_v57, %v95_v55  ;;  %v65_v1 = vld [vmem:[#allocation6 + $0x50] sm:$0xff]  ;;  %v66_v2 = vld [vmem:[#allocation6 + $0x58] sm:$0xff]  ;;  %v687_v4 = vpack.c.bf16 %v114_v61, %v113_v60  ;;  %v83_v6 = vld [vmem:[#allocation6 + $0xe0] sm:$0xff] }
  0x36   :  { %v97_v3 = vld [vmem:[#allocation6 + $0x150] sm:$0xff]  ;;  %v98_v5 = vld [vmem:[#allocation6 + $0x158] sm:$0xff]  ;;  %v84_v7 = vld [vmem:[#allocation6 + $0xe8] sm:$0xff]  ;;  %v657_v10 = vpack.c.bf16 %v66_v2, %v65_v1 }
  0x37   :  { %650 = vmatpush3.bf16.msra.mxu0 %v649_v50  ;;  %v115_v8 = vld [vmem:[#allocation6 + $0x1e0] sm:$0xff]  ;;  %v116_v9 = vld [vmem:[#allocation6 + $0x1e8] sm:$0xff]  ;;  %v689_v13 = vpack.c.bf16 %v98_v5, %v97_v3  ;;  %v659_v14 = vpack.c.bf16 %v84_v7, %v83_v6  ;;  %v50_v17 = vld [vmem:[#allocation3 + $0x18] sm:$0xff] }
  0x38   :  { %682 = vmatpush3.bf16.msra.mxu1 %v681_v51  ;;  %652 = vmatprep.subr.bf16.mxu0 %v651_v52  ;;  %v67_v11 = vld [vmem:[#allocation6 + $0x60] sm:$0xff]  ;;  %v68_v12 = vld [vmem:[#allocation6 + $0x68] sm:$0xff]  ;;  %v691_v18 = vpack.c.bf16 %v116_v9, %v115_v8  ;;  %v85_v20 = vld [vmem:[#allocation6 + $0xf0] sm:$0xff] }
  0x39   :  { %684 = vmatprep.subr.bf16.mxu1 %v683_v56  ;;  %v99_v15 = vld [vmem:[#allocation6 + $0x160] sm:$0xff]  ;;  %v48_v16 = vld [vmem:[#allocation3 + $0x8] sm:$0xff]  ;;  %v86_v21 = vld [vmem:[#allocation6 + $0xf8] sm:$0xff]  ;;  %317 = vmatprep.mubr.f32.mxu1 %v50_v17  ;;  %v661_v24 = vpack.c.bf16 %v68_v12, %v67_v11 }
  0x3a   :  { %v100_v19 = vld [vmem:[#allocation6 + $0x168] sm:$0xff]  ;;  %247 = vmatprep.mubr.f32.mxu0 %v48_v16  ;;  %v117_v22 = vld [vmem:[#allocation6 + $0x1f0] sm:$0xff]  ;;  %v118_v23 = vld [vmem:[#allocation6 + $0x1f8] sm:$0xff]  ;;  %v663_v26 = vpack.c.bf16 %v86_v21, %v85_v20 }
  0x3b   :  { %654 = vmatpush3.bf16.msra.mxu0 %v653_v62  ;;  %v693_v25 = vpack.c.bf16 %v100_v19, %v99_v15  ;;  %v69_v27 = vld [vmem:[#allocation6 + $0x70] sm:$0xff]  ;;  %v70_v28 = vld [vmem:[#allocation6 + $0x78] sm:$0xff]  ;;  %v695_v30 = vpack.c.bf16 %v118_v23, %v117_v22  ;;  %v135_v32 = vld [vmem:[#allocation6 + $0x280] sm:$0xff] }
  0x3c   :  { %686 = vmatpush3.bf16.msra.mxu1 %v685_v63  ;;  %656 = vmatprep.subr.bf16.mxu0 %v655_v0  ;;  %v101_v29 = vld [vmem:[#allocation6 + $0x170] sm:$0xff]  ;;  %v102_v31 = vld [vmem:[#allocation6 + $0x178] sm:$0xff]  ;;  %v136_v33 = vld [vmem:[#allocation6 + $0x288] sm:$0xff]  ;;  %v665_v36 = vpack.c.bf16 %v70_v28, %v69_v27 }
  0x3d   :  { %688 = vmatprep.subr.bf16.mxu1 %v687_v4  ;;  %v167_v34 = vld [vmem:[#allocation6 + $0x380] sm:$0xff]  ;;  %v168_v35 = vld [vmem:[#allocation6 + $0x388] sm:$0xff]  ;;  %v697_v37 = vpack.c.bf16 %v102_v31, %v101_v29  ;;  %v699_v38 = vpack.c.bf16 %v136_v33, %v135_v32  ;;  %v137_v44 = vld [vmem:[#allocation6 + $0x290] sm:$0xff] }
  0x3e   :  { %v119_v39 = vld [vmem:[#allocation6 + $0x200] sm:$0xff]  ;;  %v120_v40 = vld [vmem:[#allocation6 + $0x208] sm:$0xff]  ;;  %v731_v42 = vpack.c.bf16 %v168_v35, %v167_v34  ;;  %v138_v45 = vld [vmem:[#allocation6 + $0x298] sm:$0xff] }
  0x3f   :  { %658 = vmatpush3.bf16.msra.mxu0 %v657_v10  ;;  %v151_v41 = vld [vmem:[#allocation6 + $0x300] sm:$0xff]  ;;  %v152_v43 = vld [vmem:[#allocation6 + $0x308] sm:$0xff]  ;;  %v169_v46 = vld [vmem:[#allocation6 + $0x390] sm:$0xff]  ;;  %v701_v50 = vpack.c.bf16 %v120_v40, %v119_v39  ;;  %v703_v52 = vpack.c.bf16 %v138_v45, %v137_v44 }
  0x40   :  { %690 = vmatpush3.bf16.msra.mxu1 %v689_v13  ;;  %660 = vmatprep.subr.bf16.mxu0 %v659_v14  ;;  %v170_v47 = vld [vmem:[#allocation6 + $0x398] sm:$0xff]  ;;  %v47_v48 = vld [vmem:[#allocation3] sm:$0xff]  ;;  %v49_v49 = vld [vmem:[#allocation3 + $0x10] sm:$0xff]  ;;  %v733_v51 = vpack.c.bf16 %v152_v43, %v151_v41 }
  0x41   :  { %692 = vmatprep.subr.bf16.mxu1 %v691_v18  ;;  %v121_v53 = vld [vmem:[#allocation6 + $0x210] sm:$0xff]  ;;  %v122_v54 = vld [vmem:[#allocation6 + $0x218] sm:$0xff]  ;;  %v735_v56 = vpack.c.bf16 %v170_v47, %v169_v46  ;;  %v139_v58 = vld [vmem:[#allocation6 + $0x2a0] sm:$0xff] }
  0x42   :  { %v153_v55 = vld [vmem:[#allocation6 + $0x310] sm:$0xff]  ;;  %v154_v57 = vld [vmem:[#allocation6 + $0x318] sm:$0xff]  ;;  %v140_v59 = vld [vmem:[#allocation6 + $0x2a8] sm:$0xff]  ;;  %v705_v62 = vpack.c.bf16 %v122_v54, %v121_v53 }
  0x43   :  { %662 = vmatpush3.bf16.msra.mxu0 %v661_v24  ;;  %v171_v60 = vld [vmem:[#allocation6 + $0x3a0] sm:$0xff]  ;;  %v172_v61 = vld [vmem:[#allocation6 + $0x3a8] sm:$0xff]  ;;  %v737_v63 = vpack.c.bf16 %v154_v57, %v153_v55  ;;  %v707_v0 = vpack.c.bf16 %v140_v59, %v139_v58  ;;  %v141_v6 = vld [vmem:[#allocation6 + $0x2b0] sm:$0xff] }
  0x44   :  { %694 = vmatpush3.bf16.msra.mxu1 %v693_v25  ;;  %664 = vmatprep.subr.bf16.mxu0 %v663_v26  ;;  %v123_v1 = vld [vmem:[#allocation6 + $0x220] sm:$0xff]  ;;  %v124_v2 = vld [vmem:[#allocation6 + $0x228] sm:$0xff]  ;;  %v739_v4 = vpack.c.bf16 %v172_v61, %v171_v60  ;;  %v142_v7 = vld [vmem:[#allocation6 + $0x2b8] sm:$0xff] }
  0x45   :  { %696 = vmatprep.subr.bf16.mxu1 %v695_v30  ;;  %v155_v3 = vld [vmem:[#allocation6 + $0x320] sm:$0xff]  ;;  %v156_v5 = vld [vmem:[#allocation6 + $0x328] sm:$0xff]  ;;  %v173_v8 = vld [vmem:[#allocation6 + $0x3b0] sm:$0xff]  ;;  %v709_v10 = vpack.c.bf16 %v124_v2, %v123_v1  ;;  %v711_v12 = vpack.c.bf16 %v142_v7, %v141_v6 }
  0x46   :  { %v174_v9 = vld [vmem:[#allocation6 + $0x3b8] sm:$0xff]  ;;  %v741_v11 = vpack.c.bf16 %v156_v5, %v155_v3  ;;  %v125_v13 = vld [vmem:[#allocation6 + $0x230] sm:$0xff]  ;;  %v143_v18 = vld [vmem:[#allocation6 + $0x2c0] sm:$0xff] }
  0x47   :  { %666 = vmatpush3.bf16.msra.mxu0 %v665_v36  ;;  %v126_v14 = vld [vmem:[#allocation6 + $0x238] sm:$0xff]  ;;  %v157_v15 = vld [vmem:[#allocation6 + $0x330] sm:$0xff]  ;;  %v743_v16 = vpack.c.bf16 %v174_v9, %v173_v8  ;;  %v144_v19 = vld [vmem:[#allocation6 + $0x2c8] sm:$0xff] }
  0x48   :  { %698 = vmatpush3.bf16.msra.mxu1 %v697_v37  ;;  %700 = vmatprep.subr.bf16.mxu0 %v699_v38  ;;  %v158_v17 = vld [vmem:[#allocation6 + $0x338] sm:$0xff]  ;;  %v175_v20 = vld [vmem:[#allocation6 + $0x3c0] sm:$0xff]  ;;  %v176_v21 = vld [vmem:[#allocation6 + $0x3c8] sm:$0xff]  ;;  %v713_v22 = vpack.c.bf16 %v126_v14, %v125_v13  ;;  %v715_v26 = vpack.c.bf16 %v144_v19, %v143_v18 }
  0x49   :  { %732 = vmatprep.subr.bf16.mxu1 %v731_v42  ;;  %v52_v23 = vld [vmem:[#allocation3 + $0x28] sm:$0xff]  ;;  %v54_v24 = vld [vmem:[#allocation3 + $0x38] sm:$0xff]  ;;  %v745_v25 = vpack.c.bf16 %v158_v17, %v157_v15  ;;  %v127_v27 = vld [vmem:[#allocation6 + $0x240] sm:$0xff]  ;;  %v747_v30 = vpack.c.bf16 %v176_v21, %v175_v20 }
  0x4a   :  { %248 = vmatmul.mubr.f32.vlgmr.msra.gmra.mrb[0].mxu0 %v47_v48  ;;  %v128_v28 = vld [vmem:[#allocation6 + $0x248] sm:$0xff]  ;;  %v159_v29 = vld [vmem:[#allocation6 + $0x340] sm:$0xff]  ;;  %v145_v32 = vld [vmem:[#allocation6 + $0x2d0] sm:$0xff] }
  0x4b   :  { %318 = vmatmul.mubr.f32.vlgmr.msra.gmra.mrb[0].mxu1 %v49_v49  ;;  %702 = vmatpush3.bf16.msra.mxu0 %v701_v50  ;;  %v160_v31 = vld [vmem:[#allocation6 + $0x348] sm:$0xff]  ;;  %v146_v33 = vld [vmem:[#allocation6 + $0x2d8] sm:$0xff]  ;;  %v177_v34 = vld [vmem:[#allocation6 + $0x3d0] sm:$0xff]  ;;  %v717_v36 = vpack.c.bf16 %v128_v28, %v127_v27 }
  0x4c   :  { %734 = vmatpush3.bf16.msra.mxu1 %v733_v51  ;;  %704 = vmatprep.subr.bf16.mxu0 %v703_v52  ;;  %v178_v35 = vld [vmem:[#allocation6 + $0x3d8] sm:$0xff]  ;;  %v749_v37 = vpack.c.bf16 %v160_v31, %v159_v29  ;;  %v719_v38 = vpack.c.bf16 %v146_v33, %v145_v32  ;;  %v129_v39 = vld [vmem:[#allocation6 + $0x250] sm:$0xff]  ;;  %v147_v44 = vld [vmem:[#allocation6 + $0x2e0] sm:$0xff] }
  0x4d   :  { %736 = vmatprep.subr.bf16.mxu1 %v735_v56  ;;  %387 = vmatprep.mubr.f32.mxu0 %v52_v23  ;;  %v130_v40 = vld [vmem:[#allocation6 + $0x258] sm:$0xff]  ;;  %v161_v41 = vld [vmem:[#allocation6 + $0x350] sm:$0xff]  ;;  %v751_v42 = vpack.c.bf16 %v178_v35, %v177_v34  ;;  %v148_v45 = vld [vmem:[#allocation6 + $0x2e8] sm:$0xff] }
  0x4e   :  { %457 = vmatprep.mubr.f32.mxu1 %v54_v24  ;;  %v162_v43 = vld [vmem:[#allocation6 + $0x358] sm:$0xff]  ;;  %v179_v46 = vld [vmem:[#allocation6 + $0x3e0] sm:$0xff]  ;;  %v180_v47 = vld [vmem:[#allocation6 + $0x3e8] sm:$0xff]  ;;  %v721_v48 = vpack.c.bf16 %v130_v40, %v129_v39  ;;  %v723_v50 = vpack.c.bf16 %v148_v45, %v147_v44 }
  0x4f   :  { %706 = vmatpush3.bf16.msra.mxu0 %v705_v62  ;;  %v753_v49 = vpack.c.bf16 %v162_v43, %v161_v41  ;;  %v131_v51 = vld [vmem:[#allocation6 + $0x260] sm:$0xff]  ;;  %v132_v52 = vld [vmem:[#allocation6 + $0x268] sm:$0xff]  ;;  %v755_v54 = vpack.c.bf16 %v180_v47, %v179_v46  ;;  %v149_v56 = vld [vmem:[#allocation6 + $0x2f0] sm:$0xff] }
  0x50   :  { %738 = vmatpush3.bf16.msra.mxu1 %v737_v63  ;;  %708 = vmatprep.subr.bf16.mxu0 %v707_v0  ;;  %v163_v53 = vld [vmem:[#allocation6 + $0x360] sm:$0xff]  ;;  %v164_v55 = vld [vmem:[#allocation6 + $0x368] sm:$0xff]  ;;  %v150_v57 = vld [vmem:[#allocation6 + $0x2f8] sm:$0xff]  ;;  %v725_v60 = vpack.c.bf16 %v132_v52, %v131_v51 }
  0x51   :  { %740 = vmatprep.subr.bf16.mxu1 %v739_v4  ;;  %v181_v58 = vld [vmem:[#allocation6 + $0x3f0] sm:$0xff]  ;;  %v182_v59 = vld [vmem:[#allocation6 + $0x3f8] sm:$0xff]  ;;  %v757_v61 = vpack.c.bf16 %v164_v55, %v163_v53  ;;  %v727_v62 = vpack.c.bf16 %v150_v57, %v149_v56  ;;  %v51_v6 = vld [vmem:[#allocation3 + $0x20] sm:$0xff] }
  0x52   :  { %v133_v63 = vld [vmem:[#allocation6 + $0x270] sm:$0xff]  ;;  %v134_v0 = vld [vmem:[#allocation6 + $0x278] sm:$0xff]  ;;  %v759_v1 = vpack.c.bf16 %v182_v59, %v181_v58 }
  0x53   :  { %710 = vmatpush3.bf16.msra.mxu0 %v709_v10  ;;  %v165_v2 = vld [vmem:[#allocation6 + $0x370] sm:$0xff]  ;;  %v166_v3 = vld [vmem:[#allocation6 + $0x378] sm:$0xff]  ;;  %v729_v4 = vpack.c.bf16 %v134_v0, %v133_v63 }
  0x54   :  { %742 = vmatpush3.bf16.msra.mxu1 %v741_v11  ;;  %712 = vmatprep.subr.bf16.mxu0 %v711_v12  ;;  %v761_v5 = vpack.c.bf16 %v166_v3, %v165_v2  ;;  %v53_v7 = vld [vmem:[#allocation3 + $0x30] sm:$0xff] }
  0x55   :  { %744 = vmatprep.subr.bf16.mxu1 %v743_v16 }
  0x57   :  { %714 = vmatpush3.bf16.msra.mxu0 %v713_v22  ;;  %v494_v22 = vld [vmem:[%s913_s2] ss:$0 sm:$0xff] }
  0x58   :  { %746 = vmatpush3.bf16.msra.mxu1 %v745_v25  ;;  %716 = vmatprep.subr.bf16.mxu0 %v715_v26 }
  0x59   :  { %748 = vmatprep.subr.bf16.mxu1 %v747_v30 }
  0x5b   :  { %718 = vmatpush3.bf16.msra.mxu0 %v717_v36 }
  0x5c   :  { %750 = vmatpush3.bf16.msra.mxu1 %v749_v37  ;;  %720 = vmatprep.subr.bf16.mxu0 %v719_v38 }
  0x5d   :  { %752 = vmatprep.subr.bf16.mxu1 %v751_v42 }
  0x5f   :  { %722 = vmatpush3.bf16.msra.mxu0 %v721_v48 }
  0x60   :  { %754 = vmatpush3.bf16.msra.mxu1 %v753_v49  ;;  %724 = vmatprep.subr.bf16.mxu0 %v723_v50 }
  0x61   :  { %756 = vmatprep.subr.bf16.mxu1 %v755_v54 }
  0x63   :  { %726 = vmatpush3.bf16.msra.mxu0 %v725_v60 }
  0x64   :  { %758 = vmatpush3.bf16.msra.mxu1 %v757_v61  ;;  %728 = vmatprep.subr.bf16.mxu0 %v727_v62 }
  0x65   :  { %760 = vmatprep.subr.bf16.mxu1 %v759_v1 }
  0x67   :  { %730 = vmatpush3.bf16.msra.mxu0 %v729_v4 }
  0x68   :  { %762 = vmatpush3.bf16.msra.mxu1 %v761_v5 }
  0x6a   :  { %388 = vmatmul.mubr.f32.vlgmr.msra.gmra.mrb[2].mxu0 %v51_v6 }
  0x6b   :  { %458 = vmatmul.mubr.f32.vlgmr.msra.gmra.mrb[2].mxu1 %v53_v7 }
 0x11d   :  { %v527_v8 = vpop.f32.mrb[0].mxu0 }
 0x11e   :  { %v562_v9 = vpop.f32.mrb[0].mxu1  ;;  %v528_v10 = vpop.f32.mrb[1].mxu0 }
 0x11f   :  { %v529_v11 = vadd.f32 %v528_v10, %v527_v8  ;;  %v563_v12 = vpop.f32.mrb[1].mxu1 }
 0x120   :  { %v564_v13 = vadd.f32 %v563_v12, %v562_v9 }
 0x122   :  { %v320_v14 = vadd.f32 %v564_v13, %v529_v11 }
 0x13d   :  { %v597_v15 = vpop.f32.mrb[2].mxu0 }
 0x13e   :  { %v598_v16 = vpop.f32.mrb[3].mxu0  ;;  %v632_v17 = vpop.f32.mrb[2].mxu1 }
 0x13f   :  { %v599_v18 = vadd.f32 %v598_v16, %v597_v15  ;;  %v633_v19 = vpop.f32.mrb[3].mxu1 }
 0x140   :  { %v634_v20 = vadd.f32 %v633_v19, %v632_v17 }
 0x141   :  { %v390_v21 = vadd.f32 %v599_v18, %v320_v14 }
 0x143   :  { %v460_v23 = vadd.f32 %v634_v20, %v390_v21 }
 0x145   :  { %v476_v24 = vadd.f32 %v494_v22, %v460_v23 }
 0x147   :  { %477 = vst [vmem:[#allocation8] sm:$0xff] %v476_v24 }
 0x148   :  { %823 = shalt.err (!%p820_p6)
}
 0x149   :  { %s824_s16 = scalar_lea.hbm %s914_s3, 128 }
 0x14a   :  { %p825_p7 = scmp.ne.s32.totalorder %s914_s3, %s824_s16  ;;  %p828_p8 = scmp.lt.u32.totalorder %s824_s16, %s914_s3 }
 0x14c   :  { %p830_p9 = pnand %p828_p8, %p825_p7 }
 0x14e   :  { %833 = shalt.err (!%p830_p9)
}
 0x14f   :  { %487 = dma.vmem_to_hbm [thread:$0]  %s485_s12, 128, %s914_s3, [#allocation5]  }
 0x150   :  { %838 = dma.done.wait [#allocation5], 128  }
 0x151   :  { %839 = vsyncadd [#allocation5], 4294967168 }
 0x152   :  { %491 = vsyncpa [#allocation4], 1 }
 0x153   :  { %492 = vsyncpa [#allocation7], 1 }
 0x154   :  { %493 = vsyncpa [#allocation5], 1 }

</bundles_post_ra>
